<compile_context>
chip_gen: v5e
topology: v5e:2x2
jax: 0.10.0
libtpu: 0.0.40
codegen_flags: <defaults>
</compile_context>

<pallas_src>
import jax
import jax.numpy as jnp
from jax.experimental import pallas as pl
from jax.experimental.pallas import tpu as pltpu


def _round_up(n, m):
    return ((n + m - 1) // m) * m


# ----------------------------------------------------------------------------
# Kernel 1: fused Conv1d(all kernel sizes) + ReLU + global max-pool + FC
# ----------------------------------------------------------------------------
def make_cnn_kernel(BT, L_out_p, KC_pad, NF_pad):
    def kernel(lhs_ref, w_ref, b_ref, mask_ref, fcw_ref, fcb_ref, out_ref):
        # Pre-im2col'd LHS: (BT, L_out_p, KC_pad) bf16; collapse leading dims
        # (L_out_p % 8 == 0 so this is a cheap sublane-aligned collapse).
        lhs = lhs_ref[...].reshape(BT * L_out_p, KC_pad)

        # One stacked contraction for every tap of every kernel size.
        h = jnp.dot(lhs, w_ref[...], preferred_element_type=jnp.float32)
        h = jnp.maximum(h + b_ref[...], 0.0)                 # bias + ReLU (f32)

        # Static {0,1} mask over (position, filter column): zeroes the positions
        # past each kernel size's valid range and the padded filter columns.
        # ReLU output >= 0 so multiply-by-0 cannot change the max-pool result.
        h = h.reshape(BT, L_out_p, NF_pad) * mask_ref[...]
        pooled = jnp.max(h, axis=1)                          # (BT, NF_pad) f32

        out_ref[...] = (
            jnp.dot(pooled.astype(jnp.bfloat16), fcw_ref[...],
                    preferred_element_type=jnp.float32)
            + fcb_ref[...])                                  # (BT, P_pad) lane-dense

    return kernel


def pack_cnn_params(conv_W, conv_b, fc_W, fc_bvec, kernel_sizes):
    """Stack conv weights of all kernel sizes into one padded RHS (done once)."""
    F = conv_W[0].shape[0]
    C_in = conv_W[0].shape[1]
    n_k = len(kernel_sizes)
    k_max = max(kernel_sizes)
    KC = k_max * C_in                       # channel pad folded into the KC pad
    KC_pad = _round_up(KC, 128)
    NF = n_k * F
    NF_pad = _round_up(NF, 128)
    P = fc_W.shape[0]
    P_pad = _round_up(P, 128)

    w_stack = jnp.zeros((KC_pad, NF_pad), jnp.float32)
    bias = jnp.zeros((1, NF_pad), jnp.float32)
    for i, (W, k) in enumerate(zip(conv_W, kernel_sizes)):   # W: (F, C_in, k)
        for dk in range(k):
            w_stack = w_stack.at[dk * C_in:(dk + 1) * C_in,
                                 i * F:(i + 1) * F].set(W[:, :, dk].T)
        bias = bias.at[0, i * F:(i + 1) * F].set(conv_b[i])
    # Invariant: rows NF..NF_pad of fc_w stay zero, so the padded filter columns
    # (which pool to 0) cannot affect the logits.
    fc_w = jnp.zeros((NF_pad, P_pad), jnp.float32).at[:NF, :P].set(fc_W.T)
    fc_b = jnp.zeros((1, P_pad), jnp.float32).at[0, :P].set(fc_bvec)

    return dict(w_stack=w_stack.astype(jnp.bfloat16), bias=bias,
                fc_w=fc_w.astype(jnp.bfloat16), fc_b=fc_b,
                F=F, C_in=C_in, k_max=k_max, KC=KC, KC_pad=KC_pad,
                NF=NF, NF_pad=NF_pad, P=P, P_pad=P_pad)


def cnn_classifier_pallas(x, packed, kernel_sizes, batch_tile=64):
    """x: (B, L, C_in) f32 -> logits (B, P) f32."""
    B, L, C_in = x.shape
    assert C_in == packed["C_in"]
    F, k_max = packed["F"], packed["k_max"]
    KC, KC_pad = packed["KC"], packed["KC_pad"]
    NF, NF_pad = packed["NF"], packed["NF_pad"]
    P, P_pad = packed["P"], packed["P_pad"]
    k_min = min(kernel_sizes)

    L_out_p = _round_up(L - k_min + 1, 8)        # sublane-aligned output positions
    L_pad = L_out_p + k_max - 1                  # zero-pad x so every window exists

    B8 = _round_up(B, 8)
    BT = min(_round_up(batch_tile, 8), B8)
    # Keep >=2 grid steps when possible so v7x's two TensorCores both get work
    # ("parallel" axis); v5e/v6e have a single TC so this is harmless there.
    if B8 // BT < 2 and BT >= 16:
        BT //= 2
    B_pad = _round_up(B8, BT)

    # im2col once in the wrapper (XLA): all taps stacked on the lane axis.
    xp = jnp.zeros((B, L_pad, C_in), x.dtype).at[:, :L, :].set(x)
    cols = jnp.concatenate([xp[:, dk:dk + L_out_p, :] for dk in range(k_max)],
                           axis=2)                           # (B, L_out_p, KC)
    lhs = jnp.zeros((B_pad, L_out_p, KC_pad), jnp.bfloat16)
    lhs = lhs.at[:B, :, :KC].set(cols.astype(jnp.bfloat16))

    # Precomputed static validity mask: position < L-k+1 per filter column,
    # 0 for padded columns.  Resident across all grid steps (constant index_map).
    vl = jnp.concatenate(
        [jnp.full((F,), L - k + 1, jnp.int32) for k in kernel_sizes])
    vl = jnp.zeros((NF_pad,), jnp.int32).at[:NF].set(vl)
    mask = (jnp.arange(L_out_p, dtype=jnp.int32)[:, None]
            < vl[None, :]).astype(jnp.float32)               # (L_out_p, NF_pad)

    out = pl.pallas_call(
        make_cnn_kernel(BT, L_out_p, KC_pad, NF_pad),
        out_shape=jax.ShapeDtypeStruct((B_pad, P_pad), jnp.float32),
        grid=(B_pad // BT,),
        in_specs=[
            pl.BlockSpec((BT, L_out_p, KC_pad), lambda i: (i, 0, 0)),
            pl.BlockSpec((KC_pad, NF_pad), lambda i: (0, 0)),
            pl.BlockSpec((1, NF_pad), lambda i: (0, 0)),
            pl.BlockSpec((L_out_p, NF_pad), lambda i: (0, 0)),
            pl.BlockSpec((NF_pad, P_pad), lambda i: (0, 0)),
            pl.BlockSpec((1, P_pad), lambda i: (0, 0)),
        ],
        out_specs=pl.BlockSpec((BT, P_pad), lambda i: (i, 0)),
        compiler_params=pltpu.CompilerParams(
            dimension_semantics=("parallel",),
            vmem_limit_bytes=32 << 20),
    )(lhs, packed["w_stack"], packed["bias"], mask, packed["fc_w"], packed["fc_b"])
    return out[:B, :P]


# ----------------------------------------------------------------------------
# Kernel 2: DEP_type attention table + se_loss (batch-tiled, one-hot counts)
# ----------------------------------------------------------------------------
def make_dep_loss_kernel(Dsz, L, L_p, BB):
    DPAD = 128
    rows = BB * L_p

    def kernel(dep_wt_ref, q_w_ref, q_b_ref, syn_ref, rel_ref, out_ref,
               table_ref, counts_ref):
        b = pl.program_id(0)

        @pl.when(b == 0)
        def _():
            # log-attention table over the Dsz relations, padded to 128 lanes.
            q = jnp.dot(q_w_ref[...], dep_wt_ref[...],
                        preferred_element_type=jnp.float32) + q_b_ref[...]   # (1, 128)
            lane = jax.lax.broadcasted_iota(jnp.int32, (1, DPAD), 1)
            q = jnp.where(lane < Dsz, q, -jnp.inf)
            q = q - jnp.max(q, axis=-1, keepdims=True)
            e = jnp.exp(q)
            att = e / jnp.sum(e, axis=-1, keepdims=True)
            logt = jnp.log(att + 1e-9)
            # relation id 0 = "no edge": adj value forced to 0 before log.
            # Finite everywhere (incl. lanes >= Dsz whose counts are always 0).
            table_ref[...] = jnp.where(lane == 0, jnp.log(jnp.float32(1e-9)), logt)
            counts_ref[...] = jnp.zeros_like(counts_ref)

        syn = syn_ref[...].reshape(rows, L)               # (BB*L_p, L)  int32
        relc = rel_ref[...].reshape(rows, 1)              # (BB*L_p, 1)  int32

        # gather syn[t, rel[t]] with a lane compare (rel[t] < L by data invariant;
        # padded rows have rel == 0 and are excluded below).
        colL = jax.lax.broadcasted_iota(jnp.int32, (rows, L), 1)
        sel = jnp.sum(jnp.where(colL == relc, syn, 0),
                      axis=1, keepdims=True)              # (rows, 1)

        valid = relc != 0                                 # rel == 0 is padding
        laneD = jax.lax.broadcasted_iota(jnp.int32, (rows, DPAD), 1)
        oneh = jnp.where(jnp.logical_and(laneD == sel, valid),
                         jnp.float32(1.0), jnp.float32(0.0))   # (rows, 128)

        # per-relation masked counts: one sublane reduce per batch tile,
        # accumulated in a resident lane-dense (1, 128) scratch.
        counts_ref[...] += jnp.sum(oneh, axis=0, keepdims=True)

        @pl.when(b == pl.num_programs(0) - 1)
        def _():
            counts = counts_ref[...]                                   # (1, 128)
            total = jnp.sum(counts * table_ref[...], axis=1, keepdims=True)
            cnt = jnp.sum(counts, axis=1, keepdims=True)
            out_ref[...] = jnp.where(cnt > 0.0,
                                     -total / jnp.maximum(cnt, 1.0),
                                     jnp.zeros_like(cnt))

    return kernel


def se_loss_pallas(dep_w, q_w, q_b, syn, rel, batch_tile=32):
    B, L, _ = syn.shape
    Dsz, Dd = dep_w.shape
    DPAD = 128
    assert Dsz <= DPAD
    L_p = _round_up(L, 8)                   # token axis padded for cheap reshapes
    BB = min(batch_tile, B)
    B_pad = _round_up(B, BB)

    syn_p = jnp.zeros((B_pad, L_p, L), jnp.int32).at[:B, :L, :].set(syn.astype(jnp.int32))
    rel_p = jnp.zeros((B_pad, L_p, 1), jnp.int32).at[:B, :L, 0].set(rel.astype(jnp.int32))
    dep_wt = jnp.zeros((Dd, DPAD), jnp.float32).at[:, :Dsz].set(
        dep_w.astype(jnp.float32).T)

    out = pl.pallas_call(
        make_dep_loss_kernel(Dsz, L, L_p, BB),
        out_shape=jax.ShapeDtypeStruct((1, 1), jnp.float32),
        grid=(B_pad // BB,),
        in_specs=[
            pl.BlockSpec((Dd, DPAD), lambda b: (0, 0)),
            pl.BlockSpec((1, Dd), lambda b: (0, 0)),
            pl.BlockSpec((1, 1), lambda b: (0, 0)),
            pl.BlockSpec((BB, L_p, L), lambda b: (b, 0, 0)),
            pl.BlockSpec((BB, L_p, 1), lambda b: (b, 0, 0)),
        ],
        out_specs=pl.BlockSpec((1, 1), lambda b: (0, 0)),
        scratch_shapes=[
            pltpu.VMEM((1, DPAD), jnp.float32),   # log-attention table
            pltpu.VMEM((1, DPAD), jnp.float32),   # per-relation masked counts
        ],
        compiler_params=pltpu.CompilerParams(
            dimension_semantics=("arbitrary",)),
    )(dep_wt, q_w.reshape(1, Dd).astype(jnp.float32),
      q_b.reshape(1, 1).astype(jnp.float32), syn_p, rel_p)
    return out[0, 0]


# ----------------------------------------------------------------------------
# Full forward (embedding glue in plain JAX, hot paths in Pallas)
# ----------------------------------------------------------------------------
def forward(params, packed_cnn, inputs, kernel_sizes):
    tok, asp, pos, head, deprel, post, mask, l, short_mask, syn_dep_adj = inputs
    B, L = tok.shape

    word_embed = params["embed"][tok]                          # (B, L, E)
    aspect_embed = params["embed"][asp]                        # (B, La, E)
    aspect_avg = jnp.mean(aspect_embed, axis=1, keepdims=True)
    aspect_rep = jnp.broadcast_to(aspect_avg, (B, L, aspect_avg.shape[2]))
    post_embed = params["post_w"][post]
    dep_embed = params["dep_w"][deprel]
    x = jnp.concatenate([word_embed, aspect_rep, post_embed, dep_embed], axis=2)
    # TODO(synk): nn.Dropout(opt.input_dropout) is identity in eval mode; no RNG applied.

    logits = cnn_classifier_pallas(x, packed_cnn, kernel_sizes)

    syn = syn_dep_adj[:, :L, :L]
    se_loss = se_loss_pallas(params["dep_w"], params["q_w"], params["q_b"],
                             syn, deprel[:, :L])
    return logits, se_loss


# ----------------------------------------------------------------------------
# Plain-JAX reference (numerical sanity check)
# ----------------------------------------------------------------------------
def reference_forward(params, inputs, kernel_sizes):
    tok, asp, pos, head, deprel, post, mask, l, short_mask, syn_dep_adj = inputs
    B, L = tok.shape
    word = params["embed"][tok]
    asp_e = params["embed"][asp]
    asp_avg = jnp.mean(asp_e, axis=1, keepdims=True)
    asp_rep = jnp.broadcast_to(asp_avg, (B, L, asp_avg.shape[2]))
    post_e = params["post_w"][post]
    dep_e = params["dep_w"][deprel]
    x = jnp.concatenate([word, asp_rep, post_e, dep_e], axis=2)   # (B, L, C)

    pooled = []
    for W, bb, k in zip(params["conv_W"], params["conv_b"], kernel_sizes):
        L_out = L - k + 1
        acc = jnp.zeros((B, L_out, W.shape[0]), jnp.float32)
        for dk in range(k):
            acc = acc + jnp.einsum("blc,fc->blf", x[:, dk:dk + L_out, :], W[:, :, dk])
        acc = jax.nn.relu(acc + bb[None, None, :])
        pooled.append(jnp.max(acc, axis=1))
    cat = jnp.concatenate(pooled, axis=1)
    logits = cat @ params["fc_W"].T + params["fc_bvec"]

    dep_w = params["dep_w"]
    q = dep_w @ params["q_w"][0] + params["q_b"][0]               # (Dsz,)
    att = jax.nn.softmax(q)
    syn = syn_dep_adj[:, :L, :L]
    adj = att[syn]
    adj = jnp.where(syn == 0, 0.0, adj)
    lg = jnp.log(adj + 1e-9)
    rel = deprel[:, :L]
    sel = jnp.take_along_axis(lg, rel[:, :, None], axis=2)[..., 0]
    mk = rel != 0
    cnt = jnp.sum(mk)
    loss = jnp.where(cnt > 0, -jnp.sum(jnp.where(mk, sel, 0.0)) / jnp.maximum(cnt, 1), 0.0)
    return logits, loss


# ----------------------------------------------------------------------------
if __name__ == "__main__":
    B, L, La = 2, 8, 4
    vocab, E = 50, 32
    post_size, post_dim = 8, 8
    dep_size, dep_dim = 10, 16
    num_filters = 32
    kernel_sizes = [2, 3]
    polarities_dim = 3
    C_in = 2 * E + post_dim + dep_dim

    key = jax.random.PRNGKey(0)
    ks = jax.random.split(key, 20)

    embed = jax.random.normal(ks[0], (vocab, E), jnp.float32)
    post_w = 0.1 * jax.random.normal(ks[1], (post_size, post_dim), jnp.float32)
    post_w = post_w.at[0].set(0.0)                    # padding_idx=0
    dep_w = 0.1 * jax.random.normal(ks[2], (dep_size, dep_dim), jnp.float32)
    dep_w = dep_w.at[0].set(0.0)                      # padding_idx=0

    conv_W, conv_b = [], []
    for i, k in enumerate(kernel_sizes):
        conv_W.append(0.1 * jax.random.normal(ks[3 + i], (num_filters, C_in, k), jnp.float32))
        conv_b.append(0.01 * jax.random.normal(ks[7 + i], (num_filters,), jnp.float32))
    fc_W = 0.1 * jax.random.normal(
        ks[11], (polarities_dim, num_filters * len(kernel_sizes)), jnp.float32)
    fc_bvec = 0.01 * jax.random.normal(ks[12], (polarities_dim,), jnp.float32)
    q_w = 0.1 * jax.random.normal(ks[13], (1, dep_dim), jnp.float32)
    q_b = 0.01 * jax.random.normal(ks[14], (1,), jnp.float32)

    params = dict(embed=embed, post_w=post_w, dep_w=dep_w,
                  conv_W=conv_W, conv_b=conv_b,
                  fc_W=fc_W, fc_bvec=fc_bvec, q_w=q_w, q_b=q_b)
    packed_cnn = pack_cnn_params(conv_W, conv_b, fc_W, fc_bvec, kernel_sizes)

    tok = jax.random.randint(ks[15], (B, L), 1, vocab, jnp.int32)
    asp = jax.random.randint(ks[16], (B, La), 1, vocab, jnp.int32)
    post = jax.random.randint(ks[17], (B, L), 0, post_size, jnp.int32)
    deprel = jax.random.randint(ks[18], (B, L), 0, L, jnp.int32)   # idx < L and < dep_size
    syn_dep_adj = jax.random.randint(ks[19], (B, L, L), 0, dep_size, jnp.int32)
    pos = jnp.zeros((B, L), jnp.int32)
    head = jnp.zeros((B, L), jnp.int32)
    mask = jnp.ones((B, L), jnp.float32)
    lens = jnp.full((B,), L, jnp.int32)
    short_mask = jnp.ones((B, L), jnp.float32)

    inputs = (tok, asp, pos, head, deprel, post, mask, lens, short_mask, syn_dep_adj)

    logits, se_loss = forward(params, packed_cnn, inputs, kernel_sizes)
    logits = jax.block_until_ready(logits)
    se_loss = jax.block_until_ready(se_loss)

    ref_logits, ref_loss = reference_forward(params, inputs, kernel_sizes)
    # bf16 MXU operands (f32 accumulation) -> loosened tolerance on logits.
    assert jnp.allclose(logits, ref_logits, atol=5e-2, rtol=5e-2), (logits, ref_logits)
    assert jnp.allclose(se_loss, ref_loss, atol=1e-3, rtol=1e-3), (se_loss, ref_loss)

    print("KERNEL_OK")
</pallas_src>

<mosaic_0001>
module attributes {stable_mosaic.version = 11 : i64} {
  func.func @kernel(%arg0: i32, %arg1: memref<8x8x384xbf16, #tpu.memory_space<vmem>>, %arg2: memref<384x128xbf16, #tpu.memory_space<vmem>>, %arg3: memref<1x128xf32, #tpu.memory_space<vmem>>, %arg4: memref<8x128xf32, #tpu.memory_space<vmem>>, %arg5: memref<128x128xbf16, #tpu.memory_space<vmem>>, %arg6: memref<1x128xf32, #tpu.memory_space<vmem>>, %arg7: memref<8x128xf32, #tpu.memory_space<vmem>>) attributes {dimension_semantics = [#tpu.dimension_semantics<parallel>], iteration_bounds = array<i64: 1>, scalar_prefetch = 0 : i64, scratch_operands = 0 : i64, tpu.core_type = #tpu.core_type<tc>, window_params = [{transform_indices = @transform_0, window_bounds = array<i64: 8, 8, 384>}, {pipeline_mode = #tpu.pipeline_mode<synchronous>, transform_indices = @transform_1, window_bounds = array<i64: 384, 128>}, {pipeline_mode = #tpu.pipeline_mode<synchronous>, transform_indices = @transform_2, window_bounds = array<i64: 1, 128>}, {pipeline_mode = #tpu.pipeline_mode<synchronous>, transform_indices = @transform_3, window_bounds = array<i64: 8, 128>}, {pipeline_mode = #tpu.pipeline_mode<synchronous>, transform_indices = @transform_4, window_bounds = array<i64: 128, 128>}, {pipeline_mode = #tpu.pipeline_mode<synchronous>, transform_indices = @transform_5, window_bounds = array<i64: 1, 128>}, {transform_indices = @transform_6, window_bounds = array<i64: 8, 128>}]} {
    %c0 = arith.constant 0 : index
    %c0_0 = arith.constant 0 : index
    %c0_1 = arith.constant 0 : index
    %0 = vector.load %arg1[%c0, %c0_0, %c0_1] : memref<8x8x384xbf16, #tpu.memory_space<vmem>>, vector<8x8x384xbf16>
    %1 = vector.shape_cast %0 : vector<8x8x384xbf16> to vector<64x384xbf16>
    %c0_2 = arith.constant 0 : index
    %c0_3 = arith.constant 0 : index
    %2 = vector.load %arg2[%c0_2, %c0_3] : memref<384x128xbf16, #tpu.memory_space<vmem>>, vector<384x128xbf16>
    %cst = arith.constant dense<0.000000e+00> : vector<64x128xf32>
    %3 = tpu.matmul %1, %2, %cst {dimension_numbers = #tpu.dot_dimension_numbers<[1], [0], [0], [1], [0, 0, 1, 1], [], []>} : vector<64x384xbf16>, vector<384x128xbf16>, vector<64x128xf32> -> vector<64x128xf32>
    %c0_4 = arith.constant 0 : index
    %c0_5 = arith.constant 0 : index
    %4 = vector.load %arg3[%c0_4, %c0_5] : memref<1x128xf32, #tpu.memory_space<vmem>>, vector<1x128xf32>
    %5 = vector.broadcast %4 : vector<1x128xf32> to vector<64x128xf32>
    %6 = arith.addf %3, %5 : vector<64x128xf32>
    %cst_6 = arith.constant 0.000000e+00 : f32
    %7 = vector.broadcast %cst_6 : f32 to vector<64x128xf32>
    %8 = arith.maximumf %6, %7 : vector<64x128xf32>
    %9 = vector.shape_cast %8 : vector<64x128xf32> to vector<8x8x128xf32>
    %c0_7 = arith.constant 0 : index
    %c0_8 = arith.constant 0 : index
    %10 = vector.load %arg4[%c0_7, %c0_8] : memref<8x128xf32, #tpu.memory_space<vmem>>, vector<8x128xf32>
    %11 = vector.shape_cast %10 : vector<8x128xf32> to vector<1x8x128xf32>
    %12 = vector.broadcast %11 : vector<1x8x128xf32> to vector<8x8x128xf32>
    %13 = arith.mulf %9, %12 : vector<8x8x128xf32>
    %cst_9 = arith.constant dense<0xFF800000> : vector<8x128xf32>
    %14 = vector.multi_reduction <maximumf>, %13, %cst_9 [1] : vector<8x8x128xf32> to vector<8x128xf32>
    %15 = arith.truncf %14 : vector<8x128xf32> to vector<8x128xbf16>
    %c0_10 = arith.constant 0 : index
    %c0_11 = arith.constant 0 : index
    %16 = vector.load %arg5[%c0_10, %c0_11] : memref<128x128xbf16, #tpu.memory_space<vmem>>, vector<128x128xbf16>
    %cst_12 = arith.constant dense<0.000000e+00> : vector<8x128xf32>
    %17 = tpu.matmul %15, %16, %cst_12 {dimension_numbers = #tpu.dot_dimension_numbers<[1], [0], [0], [1], [0, 0, 1, 1], [], []>} : vector<8x128xbf16>, vector<128x128xbf16>, vector<8x128xf32> -> vector<8x128xf32>
    %c0_13 = arith.constant 0 : index
    %c0_14 = arith.constant 0 : index
    %18 = vector.load %arg6[%c0_13, %c0_14] : memref<1x128xf32, #tpu.memory_space<vmem>>, vector<1x128xf32>
    %19 = vector.broadcast %18 : vector<1x128xf32> to vector<8x128xf32>
    %20 = arith.addf %17, %19 : vector<8x128xf32>
    %c0_15 = arith.constant 0 : index
    %c0_16 = arith.constant 0 : index
    %21 = vector.load %arg7[%c0_15, %c0_16] : memref<8x128xf32, #tpu.memory_space<vmem>>, vector<8x128xf32>
    tpu.vector_store %arg7[%c0_15, %c0_16], %20 {strides = array<i32>} : memref<8x128xf32, #tpu.memory_space<vmem>>, vector<8x128xf32>,
    return
  }
  func.func @transform_0(%arg0: i32) -> (i32, i32, i32) {
    %c0_i32 = arith.constant 0 : i32
    %c0_i32_0 = arith.constant 0 : i32
    %c0_i32_1 = arith.constant 0 : i32
    return %arg0, %c0_i32, %c0_i32_0 : i32, i32, i32
  }
  func.func @transform_1(%arg0: i32) -> (i32, i32) {
    %c0_i32 = arith.constant 0 : i32
    %c0_i32_0 = arith.constant 0 : i32
    %c0_i32_1 = arith.constant 0 : i32
    return %c0_i32, %c0_i32_0 : i32, i32
  }
  func.func @transform_2(%arg0: i32) -> (i32, i32) {
    %c0_i32 = arith.constant 0 : i32
    %c0_i32_0 = arith.constant 0 : i32
    %c0_i32_1 = arith.constant 0 : i32
    return %c0_i32, %c0_i32_0 : i32, i32
  }
  func.func @transform_3(%arg0: i32) -> (i32, i32) {
    %c0_i32 = arith.constant 0 : i32
    %c0_i32_0 = arith.constant 0 : i32
    %c0_i32_1 = arith.constant 0 : i32
    return %c0_i32, %c0_i32_0 : i32, i32
  }
  func.func @transform_4(%arg0: i32) -> (i32, i32) {
    %c0_i32 = arith.constant 0 : i32
    %c0_i32_0 = arith.constant 0 : i32
    %c0_i32_1 = arith.constant 0 : i32
    return %c0_i32, %c0_i32_0 : i32, i32
  }
  func.func @transform_5(%arg0: i32) -> (i32, i32) {
    %c0_i32 = arith.constant 0 : i32
    %c0_i32_0 = arith.constant 0 : i32
    %c0_i32_1 = arith.constant 0 : i32
    return %c0_i32, %c0_i32_0 : i32, i32
  }
  func.func @transform_6(%arg0: i32) -> (i32, i32) {
    %c0_i32 = arith.constant 0 : i32
    %c0_i32_0 = arith.constant 0 : i32
    return %arg0, %c0_i32 : i32, i32
  }
}

</mosaic_0001>

<bundles_post_ra>
// kernel: tpu_custom_call.1
= control target key start
LH: loop header
LB: loop body
LE: loop exit
PB: predicated region body
PF: predicated region fallthrough
CT: control target
= control target key end

     0   :  { %11 = vsyncpa [#allocation3], 0  ;;  %s1098_s0 = inlined_call_operand.hbm [shape: bf16[8,8,384], index: 0, kind: input, shape index: {}]   ;;  %s1099_s1 = inlined_call_operand.hbm [shape: bf16[384,128], index: 1, kind: input, shape index: {}]   ;;  %s1100_s2 = inlined_call_operand.vmem [shape: f32[1,128], index: 2, kind: input, shape index: {}]   ;;  %s1101_s3 = inlined_call_operand.hbm [shape: f32[8,128], index: 3, kind: input, shape index: {}]   ;;  %s1102_s4 = inlined_call_operand.hbm [shape: bf16[128,128], index: 4, kind: input, shape index: {}]   ;;  %s1103_s5 = inlined_call_operand.vmem [shape: f32[1,128], index: 5, kind: input, shape index: {}]   ;;  %s1104_s6 = inlined_call_operand.hbm [shape: f32[8,128], index: 6, kind: output, shape index: {}]  }
   0x1   :  { %12 = vsyncpa [#allocation6], 0 }
   0x2   :  { %13 = vsyncpa [#allocation9], 0  ;;  %s32_s23 = sshll.u32 %s1099_s1, 4  ;;  %s33_s23 = int_to_ptr.hbm [resolvable:$true] %s32_s23 }
   0x3   :  { %14 = vsyncpa [#allocation4], 0  ;;  %s1013_s24 = smov [#allocation5]   ;;  %s19_s28 = sshll.u32 %s1098_s0, 4  ;;  %s20_s28 = int_to_ptr.hbm [resolvable:$true] %s19_s28 }
   0x4   :  { %s34_s25 = sshll.u32 %s1013_s24, 4  ;;  %s1014_s29 = smov 64   ;;  %s35_s25 = int_to_ptr.vmem [resolvable:$true] %s34_s25 }
   0x5   :  { %s1015_s30 = smov 4   ;;  %s1016_s7 = smov [#allocation2]  }
   0x6   :  { %40 = dma.hbm_to_vmem [thread:$0]  %s33_s23, 3072, %s35_s25, [#allocation6], %s1014_s29, %s1014_s29, %s1015_s30  }
   0x7   :  { %s21_s8 = sshll.u32 %s1016_s7, 4  ;;  %s1017_s9 = smov 192   ;;  %s22_s8 = int_to_ptr.vmem [resolvable:$true] %s21_s8 }
   0x8   :  { %s1018_s10 = smov 12   ;;  %s48_s12 = sshll.u32 %s1101_s3, 4  ;;  %s49_s12 = int_to_ptr.hbm [resolvable:$true] %s48_s12 }
   0x9   :  { %27 = dma.hbm_to_vmem [thread:$0]  %s20_s28, 1536, %s22_s8, [#allocation3], %s1017_s9, %s1017_s9, %s1018_s10  }
   0xa   :  { %s1019_s13 = smov [#allocation7]   ;;  %s58_s16 = sshll.u32 %s1102_s4, 4  ;;  %s59_s16 = int_to_ptr.hbm [resolvable:$true] %s58_s16 }
   0xb   :  { %s50_s14 = sshll.u32 %s1019_s13, 4  ;;  %s1020_s17 = smov [#allocation8]   ;;  %s51_s14 = int_to_ptr.vmem [resolvable:$true] %s50_s14 }
   0xc   :  { %53 = dma.hbm_to_vmem [thread:$0]  %s49_s12, 128, %s51_s14, [#allocation6]  }
   0xd   :  { %s60_s18 = sshll.u32 %s1020_s17, 4  ;;  %s61_s18 = int_to_ptr.vmem [resolvable:$true] %s60_s18 }
   0xe   :  { %66 = dma.hbm_to_vmem [thread:$0]  %s59_s16, 1024, %s61_s18, [#allocation9], %s1014_s29, %s1014_s29, %s1015_s30  }
   0xf   :  { %1005 = dma.done.wait [#allocation3], 1536  }
  0x10   :  { %1006 = vsyncadd [#allocation3], 4294965760 }
  0x11   :  { %1007 = dma.done.wait [#allocation6], 3200  }
  0x12   :  { %1008 = vsyncadd [#allocation6], 4294964096 }
  0x13   :  { %1009 = dma.done.wait [#allocation9], 1024  }
  0x14   :  { %1010 = vsyncadd [#allocation9], 4294966272  ;;  %v849_v0 = vld [vmem:[#allocation5 + $0x38] sm:$0xff]  ;;  %v848_v3 = vld [vmem:[#allocation5 + $0x30] sm:$0xff]  ;;  %vm557_vm0 = vcmask 1041409   ;;  %vm559_vm1 = vcmask 1042434  }
  0x15   :  { %v857_v1 = vld [vmem:[#allocation5 + $0x78] sm:$0xff]  ;;  %361 = vmatpush.bf16.msra.mxu0 %v849_v0  ;;  %v856_v4 = vld [vmem:[#allocation5 + $0x70] sm:$0xff]  ;;  %v847_v6 = vld [vmem:[#allocation5 + $0x28] sm:$0xff]  ;;  %vm561_vm2 = vcmask 1043459   ;;  %vm563_vm3 = vcmask 1044484   ;;  %vm565_vm4 = vcmask 1045509  }
  0x16   :  { %v865_v2 = vld [vmem:[#allocation5 + $0xb8] sm:$0xff]  ;;  %390 = vmatpush.bf16.msra.mxu1 %v857_v1  ;;  %v864_v5 = vld [vmem:[#allocation5 + $0xb0] sm:$0xff]  ;;  %v855_v7 = vld [vmem:[#allocation5 + $0x68] sm:$0xff]  ;;  %vm567_vm5 = vcmask 1046534   ;;  %vm569_vm6 = vcmask 1047559   ;;  %s1021_s20 = smov [#allocation10]  }
  0x17   :  { %419 = vmatpush.bf16.msra.mxu2 %v865_v2  ;;  %v863_v8 = vld [vmem:[#allocation5 + $0xa8] sm:$0xff]  ;;  %v846_v9 = vld [vmem:[#allocation5 + $0x20] sm:$0xff]  ;;  %v845_v12 = vld [vmem:[#allocation5 + $0x18] sm:$0xff]  ;;  %s640_s21 = sshll.u32 %s1021_s20, 4  ;;  %s642_s24 = sshll.u32 %s1104_s6, 4  ;;  %s641_s21 = int_to_ptr.vmem [resolvable:$true] %s640_s21  ;;  %s643_s24 = int_to_ptr.hbm [resolvable:$true] %s642_s24 }
  0x18   :  { %v854_v10 = vld [vmem:[#allocation5 + $0x60] sm:$0xff]  ;;  %v853_v13 = vld [vmem:[#allocation5 + $0x58] sm:$0xff]  ;;  %v844_v15 = vld [vmem:[#allocation5 + $0x10] sm:$0xff] }
  0x19   :  { %362 = vmatpush.bf16.msra.mxu0 %v848_v3  ;;  %v862_v11 = vld [vmem:[#allocation5 + $0xa0] sm:$0xff]  ;;  %v861_v14 = vld [vmem:[#allocation5 + $0x98] sm:$0xff]  ;;  %v852_v16 = vld [vmem:[#allocation5 + $0x50] sm:$0xff] }
  0x1a   :  { %391 = vmatpush.bf16.msra.mxu1 %v856_v4  ;;  %v860_v17 = vld [vmem:[#allocation5 + $0x90] sm:$0xff]  ;;  %v843_v18 = vld [vmem:[#allocation5 + $0x8] sm:$0xff]  ;;  %v842_v21 = vld [vmem:[#allocation5] sm:$0xff] }
  0x1b   :  { %420 = vmatpush.bf16.msra.mxu2 %v864_v5  ;;  %v851_v19 = vld [vmem:[#allocation5 + $0x48] sm:$0xff]  ;;  %v850_v22 = vld [vmem:[#allocation5 + $0x40] sm:$0xff]  ;;  %v658_v26 = vld [vmem:[#allocation2 + $0xc] sm:$0xf0] }
  0x1c   :  { %v859_v20 = vld [vmem:[#allocation5 + $0x88] sm:$0xff]  ;;  %v656_v23 = vld [vmem:[#allocation2] sm:$0xf]  ;;  %v830_v25 = vld [vmem:[#allocation2 + $0x4] sm:$0xf] }
  0x1d   :  { %363 = vmatpush.bf16.msra.mxu0 %v847_v6  ;;  %v831_v24 = vld [vmem:[#allocation2 + $0x8] sm:$0xf0]  ;;  %v858_v27 = vld [vmem:[#allocation5 + $0x80] sm:$0xff]  ;;  %v664_v28 = vld [vmem:[#allocation2 + $0x8] sm:$0xf]  ;;  %v661_v31 = vor.u32 %v830_v25, %v658_v26 }
  0x1e   :  { %392 = vmatpush.bf16.msra.mxu1 %v855_v7  ;;  %v832_v29 = vld [vmem:[#allocation2 + $0x10] sm:$0xf0]  ;;  %v657_v30 = vor.u32 %v831_v24, %v656_v23  ;;  %v668_v33 = vld [vmem:[#allocation2 + $0x18] sm:$0xf]  ;;  %v834_v34 = vld [vmem:[#allocation2 + $0x20] sm:$0xf0] }
  0x1f   :  { %421 = vmatpush.bf16.msra.mxu2 %v863_v8  ;;  %v665_v32 = vor.u32 %v832_v29, %v664_v28  ;;  %v833_v35 = vld [vmem:[#allocation2 + $0x1c] sm:$0xf]  ;;  %v670_v36 = vld [vmem:[#allocation2 + $0x24] sm:$0xf0]  ;;  %v676_v37 = vld [vmem:[#allocation2 + $0x20] sm:$0xf]  ;;  %v669_v39 = vor.u32 %v834_v34, %v668_v33 }
  0x20   :  { %v835_v38 = vld [vmem:[#allocation2 + $0x28] sm:$0xf0]  ;;  %v673_v40 = vor.u32 %v833_v35, %v670_v36  ;;  %v680_v42 = vld [vmem:[#allocation2 + $0x30] sm:$0xf]  ;;  %v837_v43 = vld [vmem:[#allocation2 + $0x38] sm:$0xf0] }
  0x21   :  { %364 = vmatpush.bf16.msra.mxu0 %v846_v9  ;;  %v677_v41 = vor.u32 %v835_v38, %v676_v37  ;;  %v836_v44 = vld [vmem:[#allocation2 + $0x34] sm:$0xf]  ;;  %v682_v45 = vld [vmem:[#allocation2 + $0x3c] sm:$0xf0]  ;;  %v688_v46 = vld [vmem:[#allocation2 + $0x38] sm:$0xf]  ;;  %v681_v48 = vor.u32 %v837_v43, %v680_v42 }
  0x22   :  { %393 = vmatpush.bf16.msra.mxu1 %v854_v10  ;;  %v838_v47 = vld [vmem:[#allocation2 + $0x40] sm:$0xf0]  ;;  %v685_v49 = vor.u32 %v836_v44, %v682_v45  ;;  %v692_v51 = vld [vmem:[#allocation2 + $0x48] sm:$0xf]  ;;  %v840_v52 = vld [vmem:[#allocation2 + $0x50] sm:$0xf0] }
  0x23   :  { %422 = vmatpush.bf16.msra.mxu2 %v862_v11  ;;  %v689_v50 = vor.u32 %v838_v47, %v688_v46  ;;  %v839_v53 = vld [vmem:[#allocation2 + $0x4c] sm:$0xf]  ;;  %v694_v54 = vld [vmem:[#allocation2 + $0x54] sm:$0xf0]  ;;  %v700_v55 = vld [vmem:[#allocation2 + $0x50] sm:$0xf]  ;;  %v693_v57 = vor.u32 %v840_v52, %v692_v51 }
  0x24   :  { %v841_v56 = vld [vmem:[#allocation2 + $0x58] sm:$0xf0]  ;;  %v697_v58 = vor.u32 %v839_v53, %v694_v54  ;;  %v873_v7 = vld [vmem:[#allocation8 + $0x38] sm:$0xff]  ;;  %v870_v25 = vld [vmem:[#allocation8 + $0x20] sm:$0xff] }
  0x25   :  { %365 = vmatpush.bf16.msra.mxu0 %v845_v12  ;;  %v701_v59 = vor.u32 %v841_v56, %v700_v55  ;;  %v1072_v8 = vld [vmem:[%s1100_s2] ss:$0 sm:$0xff]  ;;  %621 = vmatpush.bf16.msra.mxu3 %v873_v7  ;;  %v872_v9 = vld [vmem:[#allocation8 + $0x30] sm:$0xff]  ;;  %v867_v47 = vld [vmem:[#allocation8 + $0x8] sm:$0xff] }
  0x26   :  { %394 = vmatpush.bf16.msra.mxu1 %v853_v13  ;;  %v869_v33 = vld [vmem:[#allocation8 + $0x18] sm:$0xff]  ;;  %v868_v42 = vld [vmem:[#allocation8 + $0x10] sm:$0xff] }
  0x27   :  { %423 = vmatpush.bf16.msra.mxu2 %v861_v14 }
  0x29   :  { %366 = vmatpush.bf16.msra.mxu0 %v844_v15  ;;  %622 = vmatpush.bf16.msra.mxu3 %v872_v9 }
  0x2a   :  { %395 = vmatpush.bf16.msra.mxu1 %v852_v16 }
  0x2b   :  { %424 = vmatpush.bf16.msra.mxu2 %v860_v17  ;;  %v871_v17 = vld [vmem:[#allocation8 + $0x28] sm:$0xff] }
  0x2d   :  { %367 = vmatpush.bf16.msra.mxu0 %v843_v18  ;;  %623 = vmatpush.bf16.msra.mxu3 %v871_v17 }
  0x2e   :  { %396 = vmatpush.bf16.msra.mxu1 %v851_v19 }
  0x2f   :  { %425 = vmatpush.bf16.msra.mxu2 %v859_v20 }
  0x31   :  { %368 = vmatpush.bf16.msra.mxu0 %v842_v21  ;;  %624 = vmatpush.bf16.msra.mxu3 %v870_v25 }
  0x32   :  { %397 = vmatpush.bf16.msra.mxu1 %v850_v22 }
  0x33   :  { %426 = vmatpush.bf16.msra.mxu2 %v858_v27 }
  0x34   :  { %369 = vmatmul.bf16.vlgmr.msra.gmra.mxu0 %v657_v30 }
  0x35   :  { %398 = vmatmul.bf16.vlgmr.msra.gmra.mxu1 %v661_v31  ;;  %625 = vmatpush.bf16.msra.mxu3 %v869_v33 }
  0x36   :  { %427 = vmatmul.bf16.vlgmr.msra.gmra.mxu2 %v665_v32 }
  0x39   :  { %626 = vmatpush.bf16.msra.mxu3 %v868_v42 }
  0x3d   :  { %627 = vmatpush.bf16.msra.mxu3 %v867_v47 }
  0x44   :  { %374 = vmatmul.bf16.gmra.mxu0 %v669_v39  ;;  %v1080_v39 = vld [vmem:[#allocation7] sm:$0xff] }
  0x45   :  { %403 = vmatmul.bf16.gmra.mxu1 %v673_v40 }
  0x46   :  { %432 = vmatmul.bf16.gmra.mxu2 %v677_v41 }
  0x54   :  { %379 = vmatmul.bf16.gmra.mxu0 %v681_v48 }
  0x55   :  { %408 = vmatmul.bf16.gmra.mxu1 %v685_v49 }
  0x56   :  { %437 = vmatmul.bf16.gmra.mxu2 %v689_v50 }
  0x64   :  { %384 = vmatmul.bf16.gmra.mxu0 %v693_v57 }
  0x65   :  { %413 = vmatmul.bf16.gmra.mxu1 %v697_v58  ;;  %v866_v58 = vld [vmem:[#allocation8] sm:$0xff] }
  0x66   :  { %442 = vmatmul.bf16.gmra.mxu2 %v701_v59  ;;  %628 = vmatpush.bf16.msra.mxu3 %v866_v58 }
  0xb1   :  { %v370_v60 = vpop.f32.mrf.mxu0 }
  0xb2   :  { %v399_v61 = vpop.f32.mrf.mxu1  ;;  %v371_v11 = vadd.f32 %v1072_v8, %v370_v60 }
  0xb4   :  { %v400_v20 = vadd.f32 %v399_v61, %v371_v11 }
  0xb9   :  { %v428_v62 = vpop.f32.mrf.mxu2  ;;  %v372_v63 = vpop.f32.mrf.mxu0 }
  0xba   :  { %v401_v0 = vpop.f32.mrf.mxu1  ;;  %v373_v12 = vadd.f32 %v1072_v8, %v372_v63  ;;  %v429_v27 = vadd.f32 %v428_v62, %v400_v20 }
  0xbc   :  { %v402_v21 = vadd.f32 %v401_v0, %v373_v12  ;;  %v448_v36 = vmax.f32 %v429_v27, 0.0 }
  0xbe   :  { %v457_v44 = vmul.f32 %v1080_v39, %v448_v36 }
  0xc0   :  { %v465_v55 = vrot.slane %v457_v44, 4 }
  0xc1   :  { %v430_v1 = vpop.f32.mrf.mxu2  ;;  %v375_v2 = vpop.f32.mrf.mxu0 }
  0xc2   :  { %v404_v3 = vpop.f32.mrf.mxu1  ;;  %v376_v10 = vadd.f32 %v1072_v8, %v375_v2  ;;  %v431_v22 = vadd.f32 %v430_v1, %v402_v21  ;;  %v466_v1 = vmax.f32 %v457_v44, %v465_v55 }
  0xc4   :  { %v405_v18 = vadd.f32 %v404_v3, %v376_v10  ;;  %v449_v30 = vmax.f32 %v431_v22, 0.0  ;;  %v467_v12 = vrot.slane %v466_v1, 2 }
  0xc6   :  { %v458_v41 = vmul.f32 %v1080_v39, %v449_v30  ;;  %v468_v22 = vmax.f32 %v466_v1, %v467_v12 }
  0xc8   :  { %v471_v50 = vrot.slane %v458_v41, 4  ;;  %v469_v33 = vrot.slane %v468_v22, 1 }
  0xc9   :  { %v433_v4 = vpop.f32.mrf.mxu2  ;;  %v377_v5 = vpop.f32.mrf.mxu0 }
  0xca   :  { %v406_v6 = vpop.f32.mrf.mxu1  ;;  %v378_v14 = vadd.f32 %v1072_v8, %v377_v5  ;;  %v434_v26 = vadd.f32 %v433_v4, %v405_v18  ;;  %v472_v61 = vmax.f32 %v458_v41, %v471_v50 }
  0xcc   :  { %v407_v23 = vadd.f32 %v406_v6, %v378_v14  ;;  %v450_v34 = vmax.f32 %v434_v26, 0.0  ;;  %v473_v6 = vrot.slane %v472_v61, 2 }
  0xce   :  { %v459_v43 = vmul.f32 %v1080_v39, %v450_v34  ;;  %v474_v17 = vmax.f32 %v472_v61, %v473_v6 }
  0xd0   :  { %v477_v53 = vrot.slane %v459_v43, 4 }
  0xd1   :  { %v435_v13 = vpop.f32.mrf.mxu2  ;;  %v380_v15 = vpop.f32.mrf.mxu0 }
  0xd2   :  { %v409_v16 = vpop.f32.mrf.mxu1  ;;  %v381_v19 = vadd.f32 %v1072_v8, %v380_v15  ;;  %v436_v28 = vadd.f32 %v435_v13, %v407_v23  ;;  %v478_v0 = vmax.f32 %v459_v43, %v477_v53  ;;  %v470_v43 = vmax.f32 %v468_v22, %v469_v33 }
  0xd4   :  { %v410_v24 = vadd.f32 %v409_v16, %v381_v19  ;;  %v451_v37 = vmax.f32 %v436_v28, 0.0  ;;  %v479_v11 = vrot.slane %v478_v0, 2  ;;  %v475_v28 = vrot.slane %v474_v17, 1 }
  0xd5   :  { %v513_v53 = vpack.c.bf16 %v470_v43, %v470_v43 }
  0xd6   :  { %v460_v45 = vmul.f32 %v1080_v39, %v451_v37  ;;  %v480_v20 = vmax.f32 %v478_v0, %v479_v11  ;;  %v476_v37 = vmax.f32 %v474_v17, %v475_v28 }
  0xd7   :  { %v549_v61 = vunpack.c.l.b16 %v513_v53 }
  0xd8   :  { %v483_v56 = vrot.slane %v460_v45, 4 }
  0xd9   :  { %v438_v29 = vpop.f32.mrf.mxu2  ;;  %v382_v32 = vpop.f32.mrf.mxu0 }
  0xda   :  { %v439_v31 = vadd.f32 %v438_v29, %v410_v24  ;;  %v411_v35 = vpop.f32.mrf.mxu1  ;;  %v383_v38 = vadd.f32 %v1072_v8, %v382_v32  ;;  %v484_v2 = vmax.f32 %v460_v45, %v483_v56  ;;  %v481_v32 = vrot.slane %v480_v20, 1 }
  0xdc   :  { %v452_v40 = vmax.f32 %v439_v31, 0.0  ;;  %v412_v46 = vadd.f32 %v411_v35, %v383_v38  ;;  %v485_v13 = vrot.slane %v484_v2, 2  ;;  %v482_v42 = vmax.f32 %v480_v20, %v481_v32 }
  0xde   :  { %v461_v48 = vmul.f32 %v1080_v39, %v452_v40  ;;  %v486_v23 = vmax.f32 %v484_v2, %v485_v13 }
  0xe0   :  { %v489_v59 = vrot.slane %v461_v48, 4 }
  0xe1   :  { %v440_v49 = vpop.f32.mrf.mxu2  ;;  %v385_v52 = vpop.f32.mrf.mxu0 }
  0xe2   :  { %v441_v51 = vadd.f32 %v440_v49, %v412_v46  ;;  %v386_v54 = vadd.f32 %v1072_v8, %v385_v52  ;;  %v414_v60 = vpop.f32.mrf.mxu1  ;;  %v490_v4 = vmax.f32 %v461_v48, %v489_v59  ;;  %v514_v48 = vpack.c.bf16 %v476_v37, %v476_v37 }
  0xe4   :  { %v453_v57 = vmax.f32 %v441_v51, 0.0  ;;  %v415_v63 = vadd.f32 %v414_v60, %v386_v54  ;;  %v491_v16 = vrot.slane %v490_v4, 2  ;;  %v515_v51 = vpack.c.bf16 %v482_v42, %v482_v42 }
  0xe6   :  { %v462_v62 = vmul.f32 %v1080_v39, %v453_v57  ;;  %v492_v26 = vmax.f32 %v490_v4, %v491_v16  ;;  %v550_v57 = vunpack.c.l.b16 %v514_v48 }
  0xe8   :  { %v495_v3 = vrot.slane %v462_v62, 4  ;;  %v493_v36 = vrot.slane %v492_v26, 1  ;;  %v558_v1 = vsel %vm557_vm0, %v550_v57, %v549_v61 }
  0xe9   :  { %v443_v5 = vpop.f32.mrf.mxu2  ;;  %v387_v10 = vpop.f32.mrf.mxu0 }
  0xea   :  { %v496_v7 = vmax.f32 %v462_v62, %v495_v3  ;;  %v444_v9 = vadd.f32 %v443_v5, %v415_v63  ;;  %v388_v15 = vadd.f32 %v1072_v8, %v387_v10  ;;  %v416_v21 = vpop.f32.mrf.mxu1  ;;  %v487_v8 = vrot.slane %v486_v23, 1 }
  0xeb   :  { %v494_v47 = vmax.f32 %v492_v26, %v493_v36 }
  0xec   :  { %v454_v14 = vmax.f32 %v444_v9, 0.0  ;;  %v497_v18 = vrot.slane %v496_v7, 2  ;;  %v417_v25 = vadd.f32 %v416_v21, %v388_v15  ;;  %v488_v44 = vmax.f32 %v486_v23, %v487_v8  ;;  %v884_v15 = vld [vmem:[%s1103_s5] ss:$0 sm:$0xff] }
  0xed   :  { %v517_v56 = vpack.c.bf16 %v494_v47, %v494_v47 }
  0xee   :  { %v463_v19 = vmul.f32 %v1080_v39, %v454_v14  ;;  %v498_v29 = vmax.f32 %v496_v7, %v497_v18  ;;  %v516_v54 = vpack.c.bf16 %v488_v44, %v488_v44 }
  0xef   :  { %v553_v0 = vunpack.c.l.b16 %v517_v56 }
  0xf0   :  { %v501_v24 = vrot.slane %v463_v19, 4  ;;  %v499_v38 = vrot.slane %v498_v29, 1  ;;  %v552_v62 = vunpack.c.l.b16 %v516_v54 }
  0xf1   :  { %v445_v27 = vpop.f32.mrf.mxu2 }
  0xf2   :  { %v502_v30 = vmax.f32 %v463_v19, %v501_v24  ;;  %v446_v31 = vadd.f32 %v445_v27, %v417_v25  ;;  %v500_v49 = vmax.f32 %v498_v29, %v499_v38 }
  0xf4   :  { %v503_v34 = vrot.slane %v502_v30, 2  ;;  %v455_v35 = vmax.f32 %v446_v31, 0.0  ;;  %v518_v58 = vpack.c.bf16 %v500_v49, %v500_v49 }
  0xf6   :  { %v504_v40 = vmax.f32 %v502_v30, %v503_v34  ;;  %v464_v41 = vmul.f32 %v1080_v39, %v455_v35  ;;  %v551_v39 = vunpack.c.l.b16 %v515_v51  ;;  %v554_v2 = vunpack.c.l.b16 %v518_v58 }
  0xf8   :  { %v505_v45 = vrot.slane %v504_v40, 1  ;;  %v507_v46 = vrot.slane %v464_v41, 4  ;;  %v560_v5 = vsel %vm559_vm1, %v551_v39, %v558_v1 }
  0xf9   :  { %v562_v7 = vsel %vm561_vm2, %v552_v62, %v560_v5 }
  0xfa   :  { %v508_v50 = vmax.f32 %v464_v41, %v507_v46  ;;  %v506_v52 = vmax.f32 %v504_v40, %v505_v45  ;;  %v564_v9 = vsel %vm563_vm3, %v553_v0, %v562_v7 }
  0xfb   :  { %v566_v11 = vsel %vm565_vm4, %v554_v2, %v564_v9 }
  0xfc   :  { %v509_v55 = vrot.slane %v508_v50, 2  ;;  %v519_v60 = vpack.c.bf16 %v506_v52, %v506_v52 }
  0xfe   :  { %v510_v59 = vmax.f32 %v508_v50, %v509_v55  ;;  %v555_v4 = vunpack.c.l.b16 %v519_v60 }
 0x100   :  { %v511_v63 = vrot.slane %v510_v59, 1  ;;  %v568_v12 = vsel %vm567_vm5, %v555_v4, %v566_v11 }
 0x102   :  { %v512_v3 = vmax.f32 %v510_v59, %v511_v63 }
 0x104   :  { %v520_v6 = vpack.c.bf16 %v512_v3, %v512_v3 }
 0x106   :  { %v556_v10 = vunpack.c.l.b16 %v520_v6 }
 0x108   :  { %v570_v13 = vsel %vm569_vm6, %v556_v10, %v568_v12 }
 0x109   :  { %v571_v14 = vpack.c.b16 %v570_v13, %v570_v13 }
 0x10b   :  { %629 = vmatmul.bf16.vlgmr.msra.gmra.mxu3 %v571_v14 }
 0x18e   :  { %v630_v16 = vpop.f32.mrf.mxu3 }
 0x18f   :  { %v631_v17 = vadd.f32 %v884_v15, %v630_v16 }
 0x191   :  { %634 = vst [vmem:[#allocation10] sm:$0xff] %v631_v17 }
 0x192   :  { %645 = dma.vmem_to_hbm [thread:$0]  %s641_s21, 128, %s643_s24, [#allocation4]  }
 0x196   :  { %v632_v18 = vpop.f32.mrf.mxu3 }
 0x197   :  { %1011 = dma.done.wait [#allocation4], 128  }
 0x198   :  { %1012 = vsyncadd [#allocation4], 4294967168 }
 0x199   :  { %650 = vsyncpa [#allocation3], 1 }
 0x19a   :  { %651 = vsyncpa [#allocation6], 1 }
 0x19b   :  { %652 = vsyncpa [#allocation9], 1 }
 0x19c   :  { %653 = vsyncpa [#allocation4], 1 }

</bundles_post_ra>
